<compile_context>
chip_gen: v7x
topology: tpu7x:2x2x1
jax: 0.10.0
libtpu: 0.0.40
codegen_flags: <defaults>
</compile_context>

<pallas_src>
import math

import jax
import jax.numpy as jnp
import numpy as np
from jax.experimental import pallas as pl
from jax.experimental.pallas import tpu as pltpu

# bf16 operands are MXU-native rate on v5e/v6e/v7x; accumulation stays f32 via
# preferred_element_type.  Flip to jnp.float32 for bit-accurate debugging (the
# demo check tightens to 1e-4 automatically).
MXU_DTYPE = jnp.bfloat16
# EUP approximate reciprocal; only enabled together with the relaxed bf16 check.
APPROX_RECIP = MXU_DTYPE != jnp.float32


# ------------------------------- fused kernel --------------------------------

def make_fused_kernel(d_model, approx_recip):
    D = d_model

    def kernel(x_ref, wkv_ref, bkv_ref, wq_ref, bq_ref, head_sum_ref,
               block_diag_ref, wo_ref, bo_ref, g_ref, beta_ref,
               o_ref, acc_ref, scores_ref):
        phase = pl.program_id(1)
        s_idx = pl.program_id(2)

        # ---------------- phase 0: accumulate k^T v over sequence tiles ------
        @pl.when(phase == 0)
        def _accumulate():
            @pl.when(s_idx == 0)
            def _():
                acc_ref[...] = jnp.zeros_like(acc_ref)

            x = x_ref[0]                                          # (tS, D) MXU dtype
            kv = (jnp.dot(x, wkv_ref[...],
                          preferred_element_type=jnp.float32)
                  + bkv_ref[...])                                 # (tS, 2D) f32
            # Production D should be a multiple of 128 so these lane slices are
            # vreg-tile-aligned views; at the small demo D they cost a copy.
            k = kv[:, :D].astype(MXU_DTYPE)
            v = kv[:, D:].astype(MXU_DTYPE)
            # Full (D, D) contraction over the tile's rows; per-head scores are
            # its block-diagonal blocks (off-diagonal FLOPs ride on otherwise
            # idle MXU on v6e/v7x; on v5e with many heads prefer a per-head
            # einsum here).  1/sqrt(d_model) is already folded into wk/bk.
            acc_ref[...] += jax.lax.dot_general(
                k, v, (((0,), (0,)), ((), ())),
                preferred_element_type=jnp.float32)

        # ---------------- phase 1: apply attention + out proj + LayerNorm ----
        @pl.when(phase == 1)
        def _apply():
            @pl.when(s_idx == 0)
            def _():
                # Finalize once per batch: zero the cross-head blocks and cast
                # to the MXU dtype for the attention-apply matmuls.
                scores_ref[...] = (acc_ref[...]
                                   * block_diag_ref[...]).astype(scores_ref.dtype)

            x = x_ref[0]                                          # (tS, D)
            q = (jnp.dot(x, wq_ref[...],
                         preferred_element_type=jnp.float32)
                 + bq_ref[...])                                   # (tS, D) f32

            # denom = 1 + sum over heads of exp(q) (torch dim=1).  The head_sum
            # matmul reduces over heads AND broadcasts back to every head slot,
            # staying lane-dense (no Dh-wide reshapes / masked partial stores).
            eq = jnp.exp(q)
            denom = 1.0 + jnp.dot(eq, head_sum_ref[...],
                                  preferred_element_type=jnp.float32)
            q1 = eq * pl.reciprocal(denom, approx=approx_recip)

            # Softmax over the head axis; q1 in (0, 1] so no max-shift needed
            # (mathematically identical to F.softmax(dim=1)).
            e1 = jnp.exp(q1)
            q2 = e1 * pl.reciprocal(
                jnp.dot(e1, head_sum_ref[...],
                        preferred_element_type=jnp.float32),
                approx=approx_recip)                              # (tS, D)

            # out = q2 @ scores (per head) == one (tS, D) x (D, D) matmul
            # against the block-diagonal score matrix.
            attn = jnp.dot(q2.astype(MXU_DTYPE), scores_ref[...],
                           preferred_element_type=jnp.float32)    # (tS, D)

            # Fused output projection + LayerNorm(eps=1e-5, biased variance).
            y = (jnp.dot(attn.astype(MXU_DTYPE), wo_ref[...],
                         preferred_element_type=jnp.float32)
                 + bo_ref[...])                                   # (tS, D)
            mean = jnp.mean(y, axis=-1, keepdims=True)
            var = jnp.mean(jnp.square(y - mean), axis=-1, keepdims=True)
            yn = (y - mean) * jax.lax.rsqrt(var + 1e-5)
            o_ref[0] = (yn * g_ref[...] + beta_ref[...]).astype(o_ref.dtype)

    return kernel


# --------------------------------- wrapper ------------------------------------

def multi_head_modular_attention(inputs, params, num_heads, *, seq_tile=None):
    B, S, D = inputs.shape
    Dh = D // num_heads
    assert num_heads * Dh == D

    # ---- sequence tile: biggest that fits the per-generation VMEM budget.
    # On v7x (64 MiB/TC) prefer the smaller end of this range.
    if seq_tile is None:
        seq_tile = S
        for cand in (512, 256, 128):
            if S % cand == 0:
                seq_tile = cand
                break
    assert S % seq_tile == 0
    assert seq_tile == S or seq_tile % 8 == 0   # (8, 128) sublane rule
    n_s = S // seq_tile

    inv_scale = 1.0 / math.sqrt(D)
    f32 = jnp.float32

    # ---- weight-side prep (done once per call, outside the hot loop):
    #  * fold 1/sqrt(d_model) into the K projection,
    #  * pack K|V into one (D, 2D) weight (phase 0), keep Q separate (phase 1),
    #  * pre-cast matmul weights to the MXU dtype (halves DMA + resident VMEM).
    wkv = jnp.concatenate([params["wk"] * inv_scale, params["wv"]],
                          axis=1).astype(MXU_DTYPE)               # (D, 2D)
    bkv = jnp.concatenate([params["bk"] * inv_scale, params["bv"]],
                          axis=0).reshape(1, 2 * D).astype(f32)
    wq = params["wq"].astype(MXU_DTYPE)                           # (D, D)
    bq = params["bq"].reshape(1, D).astype(f32)
    wo = params["wo"].astype(MXU_DTYPE)                           # (D, D)
    bo = params["bo"].reshape(1, D).astype(f32)
    gamma = params["gamma"].reshape(1, D).astype(f32)
    beta = params["beta"].reshape(1, D).astype(f32)

    # Constant 0/1 matrices for the concatenated-head layout, hoisted out of the
    # per-step path and DMA'd once as VMEM-resident inputs.
    idx = np.arange(D)
    head_sum = jnp.asarray((idx[:, None] % Dh) == (idx[None, :] % Dh),
                           dtype=f32)                             # same offset
    block_diag = jnp.asarray((idx[:, None] // Dh) == (idx[None, :] // Dh),
                             dtype=f32)                           # same head

    x_in = inputs.astype(MXU_DTYPE)

    kernel = make_fused_kernel(D, APPROX_RECIP)

    tile_spec = pl.BlockSpec((1, seq_tile, D), lambda b, p, s: (b, s, 0))
    # In phase 0 the output block index is pinned to (b, 0) and never written,
    # so no garbage writeback happens and every output block is visited in
    # consecutive grid steps.
    out_spec = pl.BlockSpec((1, seq_tile, D), lambda b, p, s: (b, s * p, 0))

    def resident(shape):
        # Constant index_map => fetched once and kept VMEM-resident; single
        # buffer (no point double-buffering a block that never changes).
        return pl.BlockSpec(shape, lambda b, p, s: (0, 0),
                            pipeline_mode=pl.Buffered(buffer_count=1))

    out = pl.pallas_call(
        kernel,
        out_shape=jax.ShapeDtypeStruct((B, S, D), jnp.float32),
        grid_spec=pltpu.PrefetchScalarGridSpec(
            num_scalar_prefetch=0,
            grid=(B, 2, n_s),                   # (batch, phase, seq tile)
            in_specs=[
                tile_spec,                      # x          (B, S, D)
                resident((D, 2 * D)),           # wkv        (bf16, K pre-scaled)
                resident((1, 2 * D)),           # bkv
                resident((D, D)),               # wq         (bf16)
                resident((1, D)),               # bq
                resident((D, D)),               # head_sum   (f32 0/1)
                resident((D, D)),               # block_diag (f32 0/1)
                resident((D, D)),               # wo         (bf16)
                resident((1, D)),               # bo
                resident((1, D)),               # gamma
                resident((1, D)),               # beta
            ],
            out_specs=out_spec,
            scratch_shapes=[
                pltpu.VMEM((D, D), jnp.float32),  # k^T v accumulator (carry)
                pltpu.VMEM((D, D), MXU_DTYPE),    # masked scores, MXU dtype
            ]),
        compiler_params=pltpu.CompilerParams(
            # B is independent (megacore-shards on v7x); the phase axis carries
            # the k^T v accumulator and the seq axis is its reduction => both
            # MUST be "arbitrary".
            dimension_semantics=("parallel", "arbitrary", "arbitrary"),
            # Raise v5e's 16 MiB scoped default; stays inside v7x's 64 MiB/TC.
            vmem_limit_bytes=32 * 1024 * 1024),
    )(x_in, wkv, bkv, wq, bq, head_sum, block_diag, wo, bo, gamma, beta)
    return out


# --------------------------- pure-JAX reference -------------------------------

def reference_forward(inputs, params, num_heads):
    B, S, D = inputs.shape
    Dh = D // num_heads
    x = inputs.reshape(B * S, D)
    k = x @ params["wk"] + params["bk"]
    q = x @ params["wq"] + params["bq"]
    v = x @ params["wv"] + params["bv"]
    split = lambda t: t.reshape(B, S, num_heads, Dh).transpose(0, 2, 1, 3)
    k, q, v = split(k), split(q), split(v)
    n = math.sqrt(D)
    scores = jnp.einsum("bhsd,bhse->bhde", k, v) / n
    eq = jnp.exp(q)
    denom = 1.0 + jnp.sum(eq, axis=1, keepdims=True)
    q1 = eq / denom
    q2 = jax.nn.softmax(q1, axis=1)
    out = jnp.einsum("bhsd,bhde->bhse", q2, scores)
    out = out.transpose(0, 2, 1, 3).reshape(B * S, D)
    y = out @ params["wo"] + params["bo"]
    mean = jnp.mean(y, axis=-1, keepdims=True)
    var = jnp.mean(jnp.square(y - mean), axis=-1, keepdims=True)
    y = (y - mean) / jnp.sqrt(var + 1e-5) * params["gamma"] + params["beta"]
    return y.reshape(B, S, D)


# ---------------------------------- main --------------------------------------

if __name__ == "__main__":
    B, S, D, H = 2, 8, 32, 4

    key = jax.random.PRNGKey(0)
    keys = jax.random.split(key, 10)
    params = {
        "wk": jax.random.normal(keys[0], (D, D), jnp.float32) * 0.1,
        "bk": jax.random.normal(keys[1], (D,), jnp.float32) * 0.01,
        "wq": jax.random.normal(keys[2], (D, D), jnp.float32) * 0.1,
        "bq": jax.random.normal(keys[3], (D,), jnp.float32) * 0.01,
        "wv": jax.random.normal(keys[4], (D, D), jnp.float32) * 0.1,
        "bv": jax.random.normal(keys[5], (D,), jnp.float32) * 0.01,
        "wo": jax.random.normal(keys[6], (D, D), jnp.float32) * 0.1,
        "bo": jax.random.normal(keys[7], (D,), jnp.float32) * 0.01,
        "gamma": jnp.ones((D,), jnp.float32),
        "beta": jnp.zeros((D,), jnp.float32),
    }
    inputs = jax.random.normal(keys[8], (B, S, D), jnp.float32)

    fwd = jax.jit(multi_head_modular_attention, static_argnums=2)
    out = jax.block_until_ready(fwd(inputs, params, H))

    ref = reference_forward(inputs, params, H)
    # bf16 MXU operands + EUP approximate reciprocal => ~1e-2-scale agreement
    # with the exact-f32 reference; f32 debug mode is checked at 1e-4.
    tol = 1e-4 if MXU_DTYPE == jnp.float32 else 3e-2
    np.testing.assert_allclose(np.asarray(out), np.asarray(ref),
                               rtol=tol, atol=tol)
    print("KERNEL_OK")
</pallas_src>

<mosaic_0001>
module attributes {stable_mosaic.version = 11 : i64} {
  func.func @kernel(%arg0: i32, %arg1: i32, %arg2: i32, %arg3: memref<1x8x32xbf16, #tpu.memory_space<vmem>>, %arg4: memref<32x64xbf16, #tpu.memory_space<vmem>>, %arg5: memref<1x64xf32, #tpu.memory_space<vmem>>, %arg6: memref<32x32xbf16, #tpu.memory_space<vmem>>, %arg7: memref<1x32xf32, #tpu.memory_space<vmem>>, %arg8: memref<32x32xf32, #tpu.memory_space<vmem>>, %arg9: memref<32x32xf32, #tpu.memory_space<vmem>>, %arg10: memref<32x32xbf16, #tpu.memory_space<vmem>>, %arg11: memref<1x32xf32, #tpu.memory_space<vmem>>, %arg12: memref<1x32xf32, #tpu.memory_space<vmem>>, %arg13: memref<1x32xf32, #tpu.memory_space<vmem>>, %arg14: memref<1x8x32xf32, #tpu.memory_space<vmem>>, %arg15: memref<32x32xf32, #tpu.memory_space<vmem>>, %arg16: memref<32x32xbf16, #tpu.memory_space<vmem>>) attributes {dimension_semantics = [#tpu.dimension_semantics<parallel>, #tpu.dimension_semantics<arbitrary>, #tpu.dimension_semantics<arbitrary>], iteration_bounds = array<i64: 2, 2, 1>, scalar_prefetch = 0 : i64, scratch_operands = 2 : i64, tpu.core_type = #tpu.core_type<tc>, window_params = [{transform_indices = @transform_0, window_bounds = array<i64: 1, 8, 32>}, {pipeline_mode = #tpu.pipeline_mode<synchronous>, transform_indices = @transform_1, window_bounds = array<i64: 32, 64>}, {pipeline_mode = #tpu.pipeline_mode<synchronous>, transform_indices = @transform_2, window_bounds = array<i64: 1, 64>}, {pipeline_mode = #tpu.pipeline_mode<synchronous>, transform_indices = @transform_3, window_bounds = array<i64: 32, 32>}, {pipeline_mode = #tpu.pipeline_mode<synchronous>, transform_indices = @transform_4, window_bounds = array<i64: 1, 32>}, {pipeline_mode = #tpu.pipeline_mode<synchronous>, transform_indices = @transform_5, window_bounds = array<i64: 32, 32>}, {pipeline_mode = #tpu.pipeline_mode<synchronous>, transform_indices = @transform_6, window_bounds = array<i64: 32, 32>}, {pipeline_mode = #tpu.pipeline_mode<synchronous>, transform_indices = @transform_7, window_bounds = array<i64: 32, 32>}, {pipeline_mode = #tpu.pipeline_mode<synchronous>, transform_indices = @transform_8, window_bounds = array<i64: 1, 32>}, {pipeline_mode = #tpu.pipeline_mode<synchronous>, transform_indices = @transform_9, window_bounds = array<i64: 1, 32>}, {pipeline_mode = #tpu.pipeline_mode<synchronous>, transform_indices = @transform_10, window_bounds = array<i64: 1, 32>}, {transform_indices = @transform_11, window_bounds = array<i64: 1, 8, 32>}]} {
    %c0_i32 = arith.constant 0 : i32
    %0 = arith.cmpi eq, %arg1, %c0_i32 : i32
    %1 = arith.extui %0 : i1 to i32
    %c0_i32_0 = arith.constant 0 : i32
    %2 = arith.cmpi ne, %1, %c0_i32_0 : i32
    scf.if %2 {
      %c0_i32_2 = arith.constant 0 : i32
      %6 = arith.cmpi eq, %arg2, %c0_i32_2 : i32
      %7 = arith.extui %6 : i1 to i32
      %c0_i32_3 = arith.constant 0 : i32
      %8 = arith.cmpi ne, %7, %c0_i32_3 : i32
      scf.if %8 {
        %cst_15 = arith.constant 0.000000e+00 : f32
        %24 = vector.broadcast %cst_15 : f32 to vector<32x32xf32>
        %c0_16 = arith.constant 0 : index
        %c0_17 = arith.constant 0 : index
        %25 = vector.load %arg15[%c0_16, %c0_17] : memref<32x32xf32, #tpu.memory_space<vmem>>, vector<32x32xf32>
        tpu.vector_store %arg15[%c0_16, %c0_17], %24 {strides = array<i32>} : memref<32x32xf32, #tpu.memory_space<vmem>>, vector<32x32xf32>,
      } else {
      }
      %c0 = arith.constant 0 : index
      %c0_4 = arith.constant 0 : index
      %c0_5 = arith.constant 0 : index
      %9 = vector.load %arg3[%c0, %c0_4, %c0_5] : memref<1x8x32xbf16, #tpu.memory_space<vmem>>, vector<1x8x32xbf16>
      %10 = vector.shape_cast %9 : vector<1x8x32xbf16> to vector<8x32xbf16>
      %c0_6 = arith.constant 0 : index
      %c0_7 = arith.constant 0 : index
      %11 = vector.load %arg4[%c0_6, %c0_7] : memref<32x64xbf16, #tpu.memory_space<vmem>>, vector<32x64xbf16>
      %cst = arith.constant dense<0.000000e+00> : vector<8x64xf32>
      %12 = tpu.matmul %10, %11, %cst {dimension_numbers = #tpu.dot_dimension_numbers<[1], [0], [0], [1], [0, 0, 1, 1], [], []>} : vector<8x32xbf16>, vector<32x64xbf16>, vector<8x64xf32> -> vector<8x64xf32>
      %c0_8 = arith.constant 0 : index
      %c0_9 = arith.constant 0 : index
      %13 = vector.load %arg5[%c0_8, %c0_9] : memref<1x64xf32, #tpu.memory_space<vmem>>, vector<1x64xf32>
      %14 = vector.broadcast %13 : vector<1x64xf32> to vector<8x64xf32>
      %15 = arith.addf %12, %14 : vector<8x64xf32>
      %16 = vector.extract_strided_slice %15 {offsets = [0, 0], sizes = [8, 32], strides = [1, 1]} : vector<8x64xf32> to vector<8x32xf32>
      %17 = arith.truncf %16 : vector<8x32xf32> to vector<8x32xbf16>
      %18 = vector.extract_strided_slice %15 {offsets = [0, 32], sizes = [8, 32], strides = [1, 1]} : vector<8x64xf32> to vector<8x32xf32>
      %19 = arith.truncf %18 : vector<8x32xf32> to vector<8x32xbf16>
      %c0_10 = arith.constant 0 : index
      %c0_11 = arith.constant 0 : index
      %20 = vector.load %arg15[%c0_10, %c0_11] : memref<32x32xf32, #tpu.memory_space<vmem>>, vector<32x32xf32>
      %cst_12 = arith.constant dense<0.000000e+00> : vector<32x32xf32>
      %21 = tpu.matmul %17, %19, %cst_12 {dimension_numbers = #tpu.dot_dimension_numbers<[0], [0], [1], [1], [0, 1, 1, 1], [], []>} : vector<8x32xbf16>, vector<8x32xbf16>, vector<32x32xf32> -> vector<32x32xf32>
      %22 = arith.addf %20, %21 : vector<32x32xf32>
      %c0_13 = arith.constant 0 : index
      %c0_14 = arith.constant 0 : index
      %23 = vector.load %arg15[%c0_13, %c0_14] : memref<32x32xf32, #tpu.memory_space<vmem>>, vector<32x32xf32>
      tpu.vector_store %arg15[%c0_13, %c0_14], %22 {strides = array<i32>} : memref<32x32xf32, #tpu.memory_space<vmem>>, vector<32x32xf32>,
    } else {
    }
    %c1_i32 = arith.constant 1 : i32
    %3 = arith.cmpi eq, %arg1, %c1_i32 : i32
    %4 = arith.extui %3 : i1 to i32
    %c0_i32_1 = arith.constant 0 : i32
    %5 = arith.cmpi ne, %4, %c0_i32_1 : i32
    scf.if %5 {
      %c0_i32_2 = arith.constant 0 : i32
      %6 = arith.cmpi eq, %arg2, %c0_i32_2 : i32
      %7 = arith.extui %6 : i1 to i32
      %c0_i32_3 = arith.constant 0 : i32
      %8 = arith.cmpi ne, %7, %c0_i32_3 : i32
      scf.if %8 {
        %c0_37 = arith.constant 0 : index
        %c0_38 = arith.constant 0 : index
        %64 = vector.load %arg15[%c0_37, %c0_38] : memref<32x32xf32, #tpu.memory_space<vmem>>, vector<32x32xf32>
        %c0_39 = arith.constant 0 : index
        %c0_40 = arith.constant 0 : index
        %65 = vector.load %arg9[%c0_39, %c0_40] : memref<32x32xf32, #tpu.memory_space<vmem>>, vector<32x32xf32>
        %66 = arith.mulf %64, %65 : vector<32x32xf32>
        %67 = arith.truncf %66 : vector<32x32xf32> to vector<32x32xbf16>
        %c0_41 = arith.constant 0 : index
        %c0_42 = arith.constant 0 : index
        %68 = vector.load %arg16[%c0_41, %c0_42] : memref<32x32xbf16, #tpu.memory_space<vmem>>, vector<32x32xbf16>
        tpu.vector_store %arg16[%c0_41, %c0_42], %67 {strides = array<i32>} : memref<32x32xbf16, #tpu.memory_space<vmem>>, vector<32x32xbf16>,
      } else {
      }
      %c0 = arith.constant 0 : index
      %c0_4 = arith.constant 0 : index
      %c0_5 = arith.constant 0 : index
      %9 = vector.load %arg3[%c0, %c0_4, %c0_5] : memref<1x8x32xbf16, #tpu.memory_space<vmem>>, vector<1x8x32xbf16>
      %10 = vector.shape_cast %9 : vector<1x8x32xbf16> to vector<8x32xbf16>
      %c0_6 = arith.constant 0 : index
      %c0_7 = arith.constant 0 : index
      %11 = vector.load %arg6[%c0_6, %c0_7] : memref<32x32xbf16, #tpu.memory_space<vmem>>, vector<32x32xbf16>
      %cst = arith.constant dense<0.000000e+00> : vector<8x32xf32>
      %12 = tpu.matmul %10, %11, %cst {dimension_numbers = #tpu.dot_dimension_numbers<[1], [0], [0], [1], [0, 0, 1, 1], [], []>} : vector<8x32xbf16>, vector<32x32xbf16>, vector<8x32xf32> -> vector<8x32xf32>
      %c0_8 = arith.constant 0 : index
      %c0_9 = arith.constant 0 : index
      %13 = vector.load %arg7[%c0_8, %c0_9] : memref<1x32xf32, #tpu.memory_space<vmem>>, vector<1x32xf32>
      %14 = vector.broadcast %13 : vector<1x32xf32> to vector<8x32xf32>
      %15 = arith.addf %12, %14 : vector<8x32xf32>
      %16 = math.exp %15 : vector<8x32xf32>
      %c0_10 = arith.constant 0 : index
      %c0_11 = arith.constant 0 : index
      %17 = vector.load %arg8[%c0_10, %c0_11] : memref<32x32xf32, #tpu.memory_space<vmem>>, vector<32x32xf32>
      %cst_12 = arith.constant dense<0.000000e+00> : vector<8x32xf32>
      %18 = tpu.matmul %16, %17, %cst_12 {dimension_numbers = #tpu.dot_dimension_numbers<[1], [0], [0], [1], [0, 0, 1, 1], [], []>} : vector<8x32xf32>, vector<32x32xf32>, vector<8x32xf32> -> vector<8x32xf32>
      %cst_13 = arith.constant 1.000000e+00 : f32
      %19 = vector.broadcast %cst_13 : f32 to vector<8x32xf32>
      %20 = arith.addf %19, %18 : vector<8x32xf32>
      %21 = tpu.reciprocal %20 {approx = true} : vector<8x32xf32> -> vector<8x32xf32>
      %22 = arith.mulf %16, %21 : vector<8x32xf32>
      %23 = math.exp %22 : vector<8x32xf32>
      %c0_14 = arith.constant 0 : index
      %c0_15 = arith.constant 0 : index
      %24 = vector.load %arg8[%c0_14, %c0_15] : memref<32x32xf32, #tpu.memory_space<vmem>>, vector<32x32xf32>
      %cst_16 = arith.constant dense<0.000000e+00> : vector<8x32xf32>
      %25 = tpu.matmul %23, %24, %cst_16 {dimension_numbers = #tpu.dot_dimension_numbers<[1], [0], [0], [1], [0, 0, 1, 1], [], []>} : vector<8x32xf32>, vector<32x32xf32>, vector<8x32xf32> -> vector<8x32xf32>
      %26 = tpu.reciprocal %25 {approx = true} : vector<8x32xf32> -> vector<8x32xf32>
      %27 = arith.mulf %23, %26 : vector<8x32xf32>
      %28 = arith.truncf %27 : vector<8x32xf32> to vector<8x32xbf16>
      %c0_17 = arith.constant 0 : index
      %c0_18 = arith.constant 0 : index
      %29 = vector.load %arg16[%c0_17, %c0_18] : memref<32x32xbf16, #tpu.memory_space<vmem>>, vector<32x32xbf16>
      %cst_19 = arith.constant dense<0.000000e+00> : vector<8x32xf32>
      %30 = tpu.matmul %28, %29, %cst_19 {dimension_numbers = #tpu.dot_dimension_numbers<[1], [0], [0], [1], [0, 0, 1, 1], [], []>} : vector<8x32xbf16>, vector<32x32xbf16>, vector<8x32xf32> -> vector<8x32xf32>
      %31 = arith.truncf %30 : vector<8x32xf32> to vector<8x32xbf16>
      %c0_20 = arith.constant 0 : index
      %c0_21 = arith.constant 0 : index
      %32 = vector.load %arg10[%c0_20, %c0_21] : memref<32x32xbf16, #tpu.memory_space<vmem>>, vector<32x32xbf16>
      %cst_22 = arith.constant dense<0.000000e+00> : vector<8x32xf32>
      %33 = tpu.matmul %31, %32, %cst_22 {dimension_numbers = #tpu.dot_dimension_numbers<[1], [0], [0], [1], [0, 0, 1, 1], [], []>} : vector<8x32xbf16>, vector<32x32xbf16>, vector<8x32xf32> -> vector<8x32xf32>
      %c0_23 = arith.constant 0 : index
      %c0_24 = arith.constant 0 : index
      %34 = vector.load %arg11[%c0_23, %c0_24] : memref<1x32xf32, #tpu.memory_space<vmem>>, vector<1x32xf32>
      %35 = vector.broadcast %34 : vector<1x32xf32> to vector<8x32xf32>
      %36 = arith.addf %33, %35 : vector<8x32xf32>
      %cst_25 = arith.constant dense<0.000000e+00> : vector<8xf32>
      %37 = vector.multi_reduction <add>, %36, %cst_25 [1] : vector<8x32xf32> to vector<8xf32>
      %38 = vector.shape_cast %37 : vector<8xf32> to vector<8x1xf32>
      %cst_26 = arith.constant 3.200000e+01 : f32
      %39 = vector.broadcast %cst_26 : f32 to vector<8x1xf32>
      %40 = arith.divf %38, %39 : vector<8x1xf32>
      %41 = vector.broadcast %40 : vector<8x1xf32> to vector<8x32xf32>
      %42 = arith.subf %36, %41 : vector<8x32xf32>
      %43 = arith.mulf %42, %42 : vector<8x32xf32>
      %cst_27 = arith.constant dense<0.000000e+00> : vector<8xf32>
      %44 = vector.multi_reduction <add>, %43, %cst_27 [1] : vector<8x32xf32> to vector<8xf32>
      %45 = vector.shape_cast %44 : vector<8xf32> to vector<8x1xf32>
      %cst_28 = arith.constant 3.200000e+01 : f32
      %46 = vector.broadcast %cst_28 : f32 to vector<8x1xf32>
      %47 = arith.divf %45, %46 : vector<8x1xf32>
      %48 = vector.broadcast %40 : vector<8x1xf32> to vector<8x32xf32>
      %49 = arith.subf %36, %48 : vector<8x32xf32>
      %cst_29 = arith.constant 9.99999974E-6 : f32
      %50 = vector.broadcast %cst_29 : f32 to vector<8x1xf32>
      %51 = arith.addf %47, %50 : vector<8x1xf32>
      %52 = math.rsqrt %51 : vector<8x1xf32>
      %53 = vector.broadcast %52 : vector<8x1xf32> to vector<8x32xf32>
      %54 = arith.mulf %49, %53 : vector<8x32xf32>
      %c0_30 = arith.constant 0 : index
      %c0_31 = arith.constant 0 : index
      %55 = vector.load %arg12[%c0_30, %c0_31] : memref<1x32xf32, #tpu.memory_space<vmem>>, vector<1x32xf32>
      %56 = vector.broadcast %55 : vector<1x32xf32> to vector<8x32xf32>
      %57 = arith.mulf %54, %56 : vector<8x32xf32>
      %c0_32 = arith.constant 0 : index
      %c0_33 = arith.constant 0 : index
      %58 = vector.load %arg13[%c0_32, %c0_33] : memref<1x32xf32, #tpu.memory_space<vmem>>, vector<1x32xf32>
      %59 = vector.broadcast %58 : vector<1x32xf32> to vector<8x32xf32>
      %60 = arith.addf %57, %59 : vector<8x32xf32>
      %c0_34 = arith.constant 0 : index
      %c0_35 = arith.constant 0 : index
      %c0_36 = arith.constant 0 : index
      %61 = vector.load %arg14[%c0_34, %c0_35, %c0_36] : memref<1x8x32xf32, #tpu.memory_space<vmem>>, vector<1x8x32xf32>
      %62 = vector.shape_cast %61 : vector<1x8x32xf32> to vector<8x32xf32>
      %63 = vector.shape_cast %60 : vector<8x32xf32> to vector<1x8x32xf32>
      tpu.vector_store %arg14[%c0_34, %c0_35, %c0_36], %63 {strides = array<i32>} : memref<1x8x32xf32, #tpu.memory_space<vmem>>, vector<1x8x32xf32>,
    } else {
    }
    return
  }
  func.func @transform_0(%arg0: i32, %arg1: i32, %arg2: i32) -> (i32, i32, i32) {
    %c0_i32 = arith.constant 0 : i32
    %c0_i32_0 = arith.constant 0 : i32
    return %arg0, %arg2, %c0_i32 : i32, i32, i32
  }
  func.func @transform_1(%arg0: i32, %arg1: i32, %arg2: i32) -> (i32, i32) {
    %c0_i32 = arith.constant 0 : i32
    %c0_i32_0 = arith.constant 0 : i32
    %c0_i32_1 = arith.constant 0 : i32
    return %c0_i32, %c0_i32_0 : i32, i32
  }
  func.func @transform_2(%arg0: i32, %arg1: i32, %arg2: i32) -> (i32, i32) {
    %c0_i32 = arith.constant 0 : i32
    %c0_i32_0 = arith.constant 0 : i32
    %c0_i32_1 = arith.constant 0 : i32
    return %c0_i32, %c0_i32_0 : i32, i32
  }
  func.func @transform_3(%arg0: i32, %arg1: i32, %arg2: i32) -> (i32, i32) {
    %c0_i32 = arith.constant 0 : i32
    %c0_i32_0 = arith.constant 0 : i32
    %c0_i32_1 = arith.constant 0 : i32
    return %c0_i32, %c0_i32_0 : i32, i32
  }
  func.func @transform_4(%arg0: i32, %arg1: i32, %arg2: i32) -> (i32, i32) {
    %c0_i32 = arith.constant 0 : i32
    %c0_i32_0 = arith.constant 0 : i32
    %c0_i32_1 = arith.constant 0 : i32
    return %c0_i32, %c0_i32_0 : i32, i32
  }
  func.func @transform_5(%arg0: i32, %arg1: i32, %arg2: i32) -> (i32, i32) {
    %c0_i32 = arith.constant 0 : i32
    %c0_i32_0 = arith.constant 0 : i32
    %c0_i32_1 = arith.constant 0 : i32
    return %c0_i32, %c0_i32_0 : i32, i32
  }
  func.func @transform_6(%arg0: i32, %arg1: i32, %arg2: i32) -> (i32, i32) {
    %c0_i32 = arith.constant 0 : i32
    %c0_i32_0 = arith.constant 0 : i32
    %c0_i32_1 = arith.constant 0 : i32
    return %c0_i32, %c0_i32_0 : i32, i32
  }
  func.func @transform_7(%arg0: i32, %arg1: i32, %arg2: i32) -> (i32, i32) {
    %c0_i32 = arith.constant 0 : i32
    %c0_i32_0 = arith.constant 0 : i32
    %c0_i32_1 = arith.constant 0 : i32
    return %c0_i32, %c0_i32_0 : i32, i32
  }
  func.func @transform_8(%arg0: i32, %arg1: i32, %arg2: i32) -> (i32, i32) {
    %c0_i32 = arith.constant 0 : i32
    %c0_i32_0 = arith.constant 0 : i32
    %c0_i32_1 = arith.constant 0 : i32
    return %c0_i32, %c0_i32_0 : i32, i32
  }
  func.func @transform_9(%arg0: i32, %arg1: i32, %arg2: i32) -> (i32, i32) {
    %c0_i32 = arith.constant 0 : i32
    %c0_i32_0 = arith.constant 0 : i32
    %c0_i32_1 = arith.constant 0 : i32
    return %c0_i32, %c0_i32_0 : i32, i32
  }
  func.func @transform_10(%arg0: i32, %arg1: i32, %arg2: i32) -> (i32, i32) {
    %c0_i32 = arith.constant 0 : i32
    %c0_i32_0 = arith.constant 0 : i32
    %c0_i32_1 = arith.constant 0 : i32
    return %c0_i32, %c0_i32_0 : i32, i32
  }
  func.func @transform_11(%arg0: i32, %arg1: i32, %arg2: i32) -> (i32, i32, i32) {
    %0 = arith.muli %arg2, %arg1 : i32
    %c0_i32 = arith.constant 0 : i32
    %c0_i32_0 = arith.constant 0 : i32
    return %arg0, %0, %c0_i32 : i32, i32, i32
  }
}

</mosaic_0001>

<bundles_post_ra>
// kernel: multi_head_modular_attention.1
= control target key start
LH: loop header
LB: loop body
LE: loop exit
PB: predicated region body
PF: predicated region fallthrough
CT: control target
= control target key end

     0   :  { %s1701_s0 = inlined_call_operand.vmem [shape: bf16[2,8,32], index: 0, kind: input, shape index: {}]   ;;  %s1702_s1 = inlined_call_operand.vmem [shape: bf16[32,64], index: 1, kind: input, shape index: {}]   ;;  %s1703_s2 = inlined_call_operand.vmem [shape: f32[1,64], index: 2, kind: input, shape index: {}]   ;;  %s1704_s3 = inlined_call_operand.vmem [shape: bf16[32,32], index: 3, kind: input, shape index: {}]   ;;  %s1705_s4 = inlined_call_operand.vmem [shape: f32[1,32], index: 4, kind: input, shape index: {}]   ;;  %s1706_s5 = inlined_call_operand.vmem [shape: f32[32,32], index: 5, kind: input, shape index: {}]   ;;  %s1707_s6 = inlined_call_operand.vmem [shape: f32[32,32], index: 6, kind: input, shape index: {}]   ;;  %s1708_s7 = inlined_call_operand.vmem [shape: bf16[32,32], index: 7, kind: input, shape index: {}]   ;;  %s1709_s8 = inlined_call_operand.vmem [shape: f32[1,32], index: 8, kind: input, shape index: {}]   ;;  %s1710_s9 = inlined_call_operand.vmem [shape: f32[1,32], index: 9, kind: input, shape index: {}]   ;;  %s1711_s10 = inlined_call_operand.vmem [shape: f32[1,32], index: 10, kind: input, shape index: {}]   ;;  %s1712_s11 = inlined_call_operand.hbm [shape: f32[2,8,32], index: 11, kind: output, shape index: {}]  }
   0x1   :  { %1717 = sst [smem:[#allocation12_spill]] %s1701_s0 }
   0x2   :  { %16 = vsyncpa [#allocation5], 0 }
   0x3   :  { %18 = vsyncpa [#allocation5 + $0x1], 0  ;;  %s1466_s17 = smov 0   ;;  %s1468_s18 = smov 0  }
   0x4   :  { %s1470_s19 = smov 0   ;;  %s1472_s20 = smov 0  }
   0x5   :  { %s1474_s21 = smov 0   ;;  %s1476_s22 = smov 0  }
   0x6   :  { %s1478_s23 = smov 0   ;;  %s1480_s24 = smov 0  }
   0x7 LB: > { %1718 = sst [smem:[#allocation7_spill]] %s1389_s22  ;;  %s1079_s25 = sadd.s32 4294967295, %s1397_s24   ;;  %s1397_s24 = sphi %s1480_s24, %s24_s24   ;;  %s1393_s23 = sphi %s1478_s23, %s1731_s23   ;;  %s1389_s22 = sphi %s1476_s22, %s1730_s22   ;;  %s1385_s21 = sphi %s1474_s21, %s1729_s21   ;;  %s1381_s20 = sphi %s1472_s20, %s1728_s20   ;;  %s1377_s19 = sphi %s1470_s19, %s1734_s19   ;;  %s1373_s18 = sphi %s1468_s18, %s1733_s18   ;;  %s1369_s17 = sphi %s1466_s17, %s1732_s17  }
   0x8   : > { %1719 = sst [smem:[#allocation8_spill]] %s1393_s23  ;;  %s1080_s26 = sadd.s32 4294967294, %s1397_s24  }
   0x9   : > { %s39_s27 = sadd.s32 1, %s1389_s22  ;;  %s43_s28 = sadd.s32 1, %s1393_s23 }
   0xa   : > { %p41_p0 = scmp.ge.s32.totalorder %s39_s27, 2  ;;  %p302_p1 = scmp.ne.s32.totalorder %s1377_s19, %s1373_s18 }
   0xb   : > { %p303_p2 = scmp.eq.s32.totalorder %s1079_s25, 3  ;;  %p308_p4 = scmp.ne.s32.totalorder %s1373_s18, %s1369_s17 }
   0xc   : > { %s1736_s27 = smov (%p41_p0, %s39_s27), 0  ;;  %s1738_s28 = smov (!%p41_p0, %s43_s28), %s1393_s23 }
   0xd   : > { %1720 = sst [smem:[#allocation9_spill]] %s1736_s27  ;;  %p1515_p3 = por %p303_p2, %p302_p1 }
   0xe   : > { %p45_p5 = scmp.ge.s32.totalorder %s1738_s28, 2  ;;  %p309_p6 = scmp.eq.s32.totalorder %s1080_s26, 3 }
   0xf   : > { %p1083_p7 = scmp.ge.s32.totalorder %s1397_s24, 1  ;;  %p367_p8 = scmp.lt.s32.totalorder %s1397_s24, 5 }
  0x10   : > { %s1740_s28 = smov (%p45_p5, %s1738_s28), 0  ;;  %p1525_p9 = por %p309_p6, %p308_p4 }
  0x11   : > { %1722 = sst [smem:[#allocation10_spill]] %s1740_s28  ;;  %p368_p10 = pnand %p1083_p7, %p367_p8 }
  0x12   : > { %s287_s12 = ssub.s32 %s1393_s23, %s1740_s28  ;;  %s292_s13 = sadd.s32 1, %s1377_s19 }
  0x13   : > { %p290_p11 = scmp.eq.s32.totalorder %s287_s12, 0  ;;  %371 = sbr.rel (%p368_p10) target bundleno = 2078 (0x81e), region = 64 }
  0x14   : > { %s1716_s15 = sand.u32 (!%p368_p10), 1, %s1373_s18   ;;  %p409_p12 = scmp.lt.s32.totalorder (!%p368_p10), %s1385_s21, 1 }
  0x15   : > { %s1533_s14 = scalar_select %p290_p11, %s1377_s19, %s292_s13  }
  0x16   : > { %s1539_s16 = sshll.u32 (!%p368_p10), %s1716_s15, 3  ;;  %s1725_s0 = sld [smem:[#allocation12_spill]] (!%p368_p10) }
  0x17   : > { %1724 = sst [smem:[#allocation11_spill]] %s1533_s14  ;;  %s408_s12 = scalar_lea.vmem (!%p368_p10), [#allocation4], %s1539_s16 }
  0x18   : > { %p1086_p13 = scmp.ne.s32.totalorder (!%p368_p10), %s1381_s20, 0 }
  0x1a   : > { %s410_s25 = scalar_select %p409_p12, %s1385_s21, 1 }
  0x1b   : > { %421 = sbr.rel (%p1086_p13) target bundleno = 607 (0x25f), region = 68  ;;  %v1287_v0 = vld [vmem:[%s1702_s1] sm:$0xff] (!%p1086_p13)   ;;  %v1399_v1 = vmov (!%p1086_p13), 0.0   ;;  %v1288_v2 = vld [vmem:[%s1702_s1 + $0x8] sm:$0xff] (!%p1086_p13)   ;;  %vm1400_vm0 = vmmov (!%p1086_p13), 0   ;;  %vm426_vm1 = vcmask (!%p1086_p13), 261120  }
  0x1c   : > { %s1085_s26 = sshll.u32 %s410_s25, 2  ;;  %1136 = vmatprep.subr.bf16.mxu0 (!%p1086_p13), %v1399_v1  ;;  %1140 = vmatprep.mubr.msk.bf16.mxu0 (!%p1086_p13), %vm1400_vm0, %v1399_v1  ;;  %427 = vst.msk [vmem:[#allocation2] sm:$0xff] (!%p1086_p13), %vm426_vm1, %v1399_v1  ;;  %428 = vst.msk [vmem:[#allocation2 + $0x8] sm:$0xff] (!%p1086_p13), %vm426_vm1, %v1399_v1  ;;  %v1087_v4 = vld [vmem:[%s1703_s2] ss:$0 sm:$0xff] (!%p1086_p13)  ;;  %s1401_s27 = smov (!%p1086_p13), 96  }
  0x1d   : > { %s1545_s28 = scalar_lea.vmem %s1725_s0, %s1085_s26  ;;  %1137 = vmatpush3.bf16.msra.mxu0 (!%p1086_p13), %v1287_v0  ;;  %429 = vst.msk [vmem:[#allocation2 + $0x10] sm:$0xff] (!%p1086_p13), %vm426_vm1, %v1399_v1  ;;  %430 = vst.msk [vmem:[#allocation2 + $0x18] sm:$0xff] (!%p1086_p13), %vm426_vm1, %v1399_v1  ;;  %vm530_vm2 = vcmask (!%p1086_p13), 1043456   ;;  %vm523_vm3 = vcmask (!%p1086_p13), 64512  }
  0x1e   : > { %1138 = vmatprep.subr.bf16.mxu0 (!%p1086_p13), %v1399_v1  ;;  %v431_v3 = vld [vmem:[%s1545_s28] sm:$0xf] (!%p1086_p13) }
  0x21   : > { %1139 = vmatpush3.bf16.msra.mxu0 (!%p1086_p13), %v1288_v2 }
  0x23   : > { %v500_v16 = vld [vmem:[#allocation2] sm:$0xff]  ;;  %v501_v21 = vld [vmem:[#allocation2 + $0x8] sm:$0xff] }
  0x24   : > { %1141 = vmatmul.mubr.msk.bf16.vlgmr.msra.gmra.mrb[0].mxu0 %vm426_vm1, %v431_v3  ;;  %v502_v15 = vld [vmem:[#allocation2 + $0x10] sm:$0xff]  ;;  %v503_v18 = vld [vmem:[#allocation2 + $0x18] sm:$0xff] }
  0xf7   : > { %v493_v5 = vpop.f32.mrb[0].mxu0 }
  0xf8   : > { %v494_v6 = vadd.f32 %v1087_v4, %v493_v5  ;;  %v1142_v7 = vpop.f32.mrb[1].mxu0 }
  0xf9   : > { %v496_v8 = vpop.f32.mrb[2].mxu0 }
  0xfa   : > { %v499_v9 = vpack.c.bf16 %v494_v6, %v494_v6  ;;  %v1143_v10 = vpop.f32.mrb[3].mxu0 }
  0xfc   : > { %521 = vrot.lane.b32.xlu0 %v499_v9, %s1401_s27 }
 0x11a   : > { %504 = vxpose.xlu0.c.b16.start.end [1/1] (short) (narrow) %v499_v9, 32 }
 0x16e   : > { %v522_v11 = vpop.permute.xlu0 %521 }
 0x16f   : > { %1208 = vmatprep.subr.msk.bf16.mxu1 %vm530_vm2, %v522_v11  ;;  %v532_v12 = vsel %vm530_vm2, %v522_v11, 0 }
 0x170   : > { %1145 = vmatpush3.bf16.msra.mxu1 %v532_v12 }
 0x180   : > { %v512_v13 = vpop.trf.xlu0 }
 0x181   : > { %1146 = vmatprep.mubr.msk.bf16.mxu1 %vm523_vm3, %v512_v13 }
 0x184   : > { %v513_v14 = vpop.trf.xlu0 }
 0x185   : > { %1147 = vmatmul.mubr.msk.bf16.vlgmr.msra.gmra.mrb[0].mxu1 %vm523_vm3, %v513_v14 }
 0x258   : > { %v1148_v17 = vpop.f32.mrb[0].mxu1 }
 0x259   : > { %v585_v19 = vadd.f32 %v1148_v17, %v502_v15  ;;  %v568_v20 = vpop.f32.mrb[1].mxu1 }
 0x25a   : > { %v583_v22 = vadd.f32 %v568_v20, %v500_v16  ;;  %v1149_v23 = vpop.f32.mrb[2].mxu1 }
 0x25b   : > { %589 = vst.msk [vmem:[#allocation2 + $0x10] sm:$0xff] %vm426_vm1, %v585_v19  ;;  %v586_v24 = vadd.f32 %v1149_v23, %v503_v18  ;;  %v571_v25 = vpop.f32.mrb[3].mxu1 }
 0x25c   : > { %587 = vst.msk [vmem:[#allocation2] sm:$0xff] %vm426_vm1, %v583_v22  ;;  %v584_v26 = vadd.f32 %v571_v25, %v501_v21 }
 0x25d   : > { %590 = vst.msk [vmem:[#allocation2 + $0x18] sm:$0xff] %vm426_vm1, %v586_v24 }
 0x25e   : > { %588 = vst.msk [vmem:[#allocation2 + $0x8] sm:$0xff] %vm426_vm1, %v584_v26 }
 0x25f PF: > { %p1093_p0 = scmp.ne.s32.totalorder %s1381_s20, 1 }
 0x260   : > { %v1289_v27 = vld [vmem:[%s1704_s3] sm:$0xff] (!%p1093_p0)   ;;  %v1402_v28 = vmov (!%p1093_p0), 0.0   ;;  %v1290_v29 = vld [vmem:[%s1704_s3 + $0x8] sm:$0xff] (!%p1093_p0)   ;;  %vm1403_vm4 = vmmov (!%p1093_p0), 0   ;;  %vm613_vm5 = vcmask (!%p1093_p0), 261120   ;;  %v688_v33 = vld [vmem:[%s1706_s5 + $0x10] sm:$0xff] (!%p1093_p0) }
 0x261   : > { %594 = sbr.rel (%p1093_p0) target bundleno = 2053 (0x805), region = 76  ;;  %1150 = vmatprep.subr.bf16.mxu0 (!%p1093_p0), %v1402_v28  ;;  %1154 = vmatprep.mubr.msk.bf16.mxu0 (!%p1093_p0), %vm1403_vm4, %v1402_v28  ;;  %v616_v30 = vld [vmem:[%s1545_s28] sm:$0xf] (!%p1093_p0)  ;;  %v687_v32 = vld [vmem:[%s1706_s5 + $0x8] sm:$0xff] (!%p1093_p0)  ;;  %v1404_v34 = vmov (!%p1093_p0), 0.0|0.0   ;;  %v689_v36 = vld [vmem:[%s1706_s5 + $0x18] sm:$0xff] (!%p1093_p0) }
 0x262   : > { %1151 = vmatpush3.bf16.msra.mxu0 (!%p1093_p0), %v1289_v27  ;;  %1166 = vmatprep.mubr.msk.f32.mxu1 (!%p1093_p0), %vm1403_vm4, %v1402_v28  ;;  %v686_v31 = vld [vmem:[%s1706_s5] sm:$0xff] (!%p1093_p0)  ;;  %v1200_v37 = vpack.c.bf16 (!%p1093_p0), %v689_v36, %v688_v33  ;;  %v604_v56 = vld [vmem:[%s1707_s6 + $0x8] sm:$0xff] (!%p1093_p0)  ;;  %v601_v60 = vld [vmem:[#allocation2 + $0x10] sm:$0xff] (!%p1093_p0) }
 0x263   : > { %1152 = vmatprep.subr.bf16.mxu0 (!%p1093_p0), %v1402_v28  ;;  %1196 = vmatprep.subr.bf16.mxu1 (!%p1093_p0), %v1404_v34  ;;  %v1197_v35 = vpack.c.bf16 (!%p1093_p0), %v687_v32, %v686_v31  ;;  %v1094_v38 = vld [vmem:[%s1705_s4] ss:$0 sm:$0xff] (!%p1093_p0)  ;;  %v605_v62 = vld [vmem:[%s1707_s6 + $0x10] sm:$0xff] (!%p1093_p0)  ;;  %v606_v63 = vld [vmem:[%s1707_s6 + $0x18] sm:$0xff] (!%p1093_p0) }
 0x264   : > { %v599_v53 = vld [vmem:[#allocation2] sm:$0xff] (!%p1093_p0)  ;;  %v602_v61 = vld [vmem:[#allocation2 + $0x18] sm:$0xff] (!%p1093_p0)  ;;  %v609_v0 = vmul.f32 (!%p1093_p0), %v605_v62, %v601_v60  ;;  %v1292_v11 = vld [vmem:[%s1708_s7 + $0x8] sm:$0xff] (!%p1093_p0)  }
 0x265   : > { %1198 = vmatpush3.bf16.msra.mxu1 (!%p1093_p0), %v1197_v35  ;;  %v600_v54 = vld [vmem:[#allocation2 + $0x8] sm:$0xff] (!%p1093_p0)  ;;  %v603_v55 = vld [vmem:[%s1707_s6] sm:$0xff] (!%p1093_p0)  ;;  %v610_v1 = vmul.f32 (!%p1093_p0), %v606_v63, %v602_v61 }
 0x266   : > { %1153 = vmatpush3.bf16.msra.mxu0 (!%p1093_p0), %v1290_v29  ;;  %1199 = vmatprep.subr.bf16.mxu1 (!%p1093_p0), %v1404_v34  ;;  %v607_v57 = vmul.f32 (!%p1093_p0), %v603_v55, %v599_v53  ;;  %v608_v58 = vmul.f32 (!%p1093_p0), %v604_v56, %v600_v54  ;;  %v1291_v5 = vld [vmem:[%s1708_s7] sm:$0xff] (!%p1093_p0)  }
 0x267   : > { %1202 = vmatprep.subr.bf16.mxu0 (!%p1093_p0), %v1404_v34  ;;  %v612_v2 = vpack.c.bf16 (!%p1093_p0), %v610_v1, %v609_v0  ;;  %v1101_v17 = vld [vmem:[%s1709_s8] ss:$0 sm:$0xff] (!%p1093_p0) }
 0x268   : > { %v611_v59 = vpack.c.bf16 %v608_v58, %v607_v57  ;;  %v1105_v33 = vld [vmem:[%s1710_s9] ss:$0 sm:$0xff] }
 0x269   : > { %1155 = vmatmul.mubr.msk.bf16.vlgmr.msra.gmra.mrb[0].mxu0 %vm613_vm5, %v616_v30  ;;  %1201 = vmatpush3.bf16.msra.mxu1 %v1200_v37  ;;  %615 = vst.msk [vmem:[#allocation3 + $0x8] sm:$0xff] %vm613_vm5, %v612_v2 }
 0x26a   : > { %1177 = vmatprep.mubr.msk.f32.mxu0 %vm1403_vm4, %v1402_v28  ;;  %1204 = vmatpush3.bf16.msra.mxu0 %v1197_v35  ;;  %614 = vst.msk [vmem:[#allocation3] sm:$0xff] %vm613_vm5, %v611_v59  ;;  %v1106_v35 = vld [vmem:[%s1711_s10] ss:$0 sm:$0xff] }
 0x26b   : > { %1205 = vmatprep.subr.bf16.mxu0 %v1404_v34  ;;  %1180 = vmatprep.subr.bf16.mxu1 %v1402_v28 }
 0x26e   : > { %1207 = vmatpush3.bf16.msra.mxu0 %v1200_v37 }
 0x26f   : > { %1188 = vmatprep.subr.bf16.mxu0 %v1402_v28 }
 0x270   : > { %v844_v4 = vld [vmem:[#allocation3 + $0x8] sm:$0xff] }
 0x271   : > { %v843_v3 = vld [vmem:[#allocation3] sm:$0xff] }
 0x33c   : > { %v678_v39 = vpop.f32.mrb[0].mxu0 }
 0x33d   : > { %v679_v40 = vadd.f32 %v1094_v38, %v678_v39  ;;  %v1156_v41 = vpop.f32.mrb[1].mxu0 }
 0x33e   : > { %v681_v42 = vpop.f32.mrb[2].mxu0 }
 0x33f   : > { %v684_v43 = vmul.f32 1.442695, %v679_v40  ;;  %v1157_v44 = vpop.f32.mrb[3].mxu0 }
 0x341   : > { %1293 = vpow2.f32 %v684_v43 }
 0x34b   : > { %v1294_v45 = vpop.eup %1293 }
 0x34c   : > { %1167 = vmatmul.mubr.msk.f32.vlgmr.msra.gmra.mrb[0].mxu1 %vm613_vm5, %v1294_v45 }
 0x34d   : > { %1184 = vmatprep.mubr.msk.bf16.mxu1 %vm1403_vm4, %v1402_v28  ;;  %1181 = vmatpush3.bf16.msra.mxu1 %v843_v3 }
 0x34e   : > { %1182 = vmatprep.subr.bf16.mxu1 %v1402_v28 }
 0x351   : > { %1183 = vmatpush3.bf16.msra.mxu1 %v844_v4 }
 0x41f   : > { %v759_v46 = vpop.f32.mrb[0].mxu1 }
 0x420   : > { %v760_v47 = vadd.f32 1.0, %v759_v46  ;;  %v1168_v48 = vpop.f32.mrb[1].mxu1 }
 0x422   : > { %1295 = vrcp.f32 %v760_v47 }
 0x42c   : > { %v1296_v49 = vpop.eup %1295 }
 0x42d   : > { %v764_v50 = vmul.f32 %v1296_v49, %v1294_v45 }
 0x42f   : > { %v765_v51 = vmul.f32 1.442695, %v764_v50 }
 0x431   : > { %1297 = vpow2.f32 %v765_v51 }
 0x43b   : > { %v1298_v52 = vpop.eup %1297 }
 0x43c   : > { %1178 = vmatmul.mubr.msk.f32.vlgmr.msra.gmra.mrb[4].mxu0 %vm613_vm5, %v1298_v52 }
 0x43d   : > { %1192 = vmatprep.mubr.msk.bf16.mxu0 %vm1403_vm4, %v1402_v28  ;;  %1189 = vmatpush3.bf16.msra.mxu0 %v1291_v5 }
 0x43e   : > { %1190 = vmatprep.subr.bf16.mxu0 %v1402_v28 }
 0x441   : > { %1191 = vmatpush3.bf16.msra.mxu0 %v1292_v11 }
 0x50f   : > { %v836_v6 = vpop.f32.mrb[4].mxu0 }
 0x510   : > { %1299 = vrcp.f32 %v836_v6  ;;  %v1179_v7 = vpop.f32.mrb[5].mxu0 }
 0x51a   : > { %v1300_v8 = vpop.eup %1299 }
 0x51b   : > { %v841_v9 = vmul.f32 %v1300_v8, %v1298_v52 }
 0x51d   : > { %v842_v10 = vpack.c.bf16 %v841_v9, %v841_v9 }
 0x51f   : > { %1185 = vmatmul.mubr.msk.bf16.vlgmr.msra.gmra.mrb[4].mxu1 %vm613_vm5, %v842_v10 }
 0x5f2   : > { %v882_v12 = vpop.f32.mrb[4].mxu1 }
 0x5f3   : > { %v888_v13 = vpack.c.bf16 %v882_v12, %v882_v12  ;;  %v1186_v14 = vpop.f32.mrb[5].mxu1 }
 0x5f4   : > { %v885_v15 = vpop.f32.mrb[6].mxu1 }
 0x5f5   : > { %v1187_v16 = vpop.f32.mrb[7].mxu1  ;;  %1193 = vmatmul.mubr.msk.bf16.vlgmr.msra.gmra.mrb[8].mxu0 %vm613_vm5, %v888_v13 }
 0x6c8   : > { %v949_v18 = vpop.f32.mrb[8].mxu0 }
 0x6c9   : > { %v950_v19 = vadd.f32 %v1101_v17, %v949_v18  ;;  %v1194_v20 = vpop.f32.mrb[9].mxu0 }
 0x6ca   : > { %v952_v21 = vpop.f32.mrb[10].mxu0 }
 0x6cb   : > { %v1195_v22 = vpop.f32.mrb[11].mxu0  ;;  %v955_v23 = vsel %vm613_vm5, %v950_v19, 0.0 }
 0x6cc   : > { %956 = vadd.xlane.f32.xlu0 %v955_v23 }
 0x759   : > { %v957_v24 = vpop.xlane.xlu0 %956 }
 0x75a   : > { %v959_v25 = vmul.f32 0.03125, %v957_v24 }
 0x75c   : > { %v960_v26 = vsub.f32 %v950_v19, %v959_v25 }
 0x75e   : > { %v961_v27 = vmul.f32 %v960_v26, %v960_v26 }
 0x760   : > { %v962_v28 = vsel %vm613_vm5, %v961_v27, 0.0 }
 0x761   : > { %963 = vadd.xlane.f32.xlu0 %v962_v28 }
 0x7ee   : > { %v964_v29 = vpop.xlane.xlu0 %963 }
 0x7ef   : > { %v965_v30 = vmul.f32 0.03125, %v964_v29 }
 0x7f1   : > { %v966_v31 = vadd.f32 1e-05, %v965_v30 }
 0x7f3   : > { %1301 = vrsqrt.f32 %v966_v31 }
 0x7fd   : > { %v1302_v32 = vpop.eup %1301 }
 0x7fe   : > { %v968_v34 = vmul.f32 %v1302_v32, %v960_v26 }
 0x800   : > { %v976_v36 = vmul.f32 %v1105_v33, %v968_v34 }
 0x802   : > { %v984_v37 = vadd.f32 %v1106_v35, %v976_v36 }
 0x804   : > { %985 = vst.msk [vmem:[%s408_s12] sm:$0xff] %vm613_vm5, %v984_v37 }
 0x805 PF: > { %s1108_s25 = sshll.u32 %s1385_s21, 7  ;;  %s1002_s22 = sshll.u32 %s408_s12, 4  ;;  %s1003_s22 = int_to_ptr.vmem [resolvable:$true] %s1002_s22 }
 0x806   : > { %s1650_s13 = scalar_lea.hbm %s1712_s11, %s1108_s25  ;;  %s1726_s23 = sand.u32 1, %s1373_s18  }
 0x807   : > { %s987_s27 = scalar_lea.sflag [#allocation5], %s1726_s23  ;;  %s1303_s14 = scalar_lea.vmem %s1003_s22, 128 }
 0x808   : > { %p1304_p1 = scmp.ne.s32.totalorder %s1003_s22, %s1303_s14  ;;  %s1405_s28 = smov [#allocation4]  }
 0x809   : > { %s1307_s15 = sshll.u32 %s1405_s28, 4  ;;  %s1308_s15 = int_to_ptr.vmem [resolvable:$false] %s1307_s15 }
 0x80a   : > { %p1305_p2 = pnand %p1304_p1, %p1515_p3  ;;  %s1309_s0 = scalar_lea.vmem %s1308_s15, 256 }
 0x80b   : > { %p1310_p5 = scmp.lt.s32.totalorder %s1003_s22, %s1308_s15  ;;  %p1311_p6 = scmp.lt.s32.totalorder %s1309_s0, %s1303_s14 }
 0x80c   : > { %p1306_p4 = pneg %p1305_p2 }
 0x80d   : > { %p1312_p7 = por %p1311_p6, %p1310_p5 }
 0x80f   : > { %p1313_p8 = pnand %p1312_p7, %p1306_p4 }
 0x811   : > { %1316 = shalt.err (!%p1313_p8)
}
 0x812   : > { %s1317_s21 = scalar_lea.hbm %s1650_s13, 128  ;;  %s1321_s25 = scalar_lea.hbm %s1712_s11, 256 }
 0x813   : > { %p1318_p10 = scmp.ne.s32.totalorder %s1650_s13, %s1317_s21  ;;  %p1322_p13 = scmp.lt.u32.totalorder %s1650_s13, %s1712_s11 }
 0x814   : > { %p1323_p0 = scmp.lt.u32.totalorder %s1321_s25, %s1317_s21  ;;  %p1325_p2 = scmp.lt.u32.totalorder %s1317_s21, %s1650_s13 }
 0x815   : > { %p1319_p11 = pnand %p1318_p10, %p1515_p3 }
 0x816   : > { %p1324_p1 = por %p1323_p0, %p1322_p13 }
 0x817   : > { %p1320_p12 = pneg %p1319_p11 }
 0x818   : > { %p1326_p4 = por %p1325_p2, %p1324_p1 }
 0x81a   : > { %p1327_p5 = pnand %p1326_p4, %p1320_p12 }
 0x81c   : > { %1330 = shalt.err (!%p1327_p5)
}
 0x81d   : > { %1209 = dma.vmem_to_hbm [thread:$0]  (%p1515_p3), %s1003_s22, 128, %s1650_s13, %s987_s27  }
 0x81e PF: > { %p1215_p6 = scmp.ge.s32.totalorder %s1397_s24, 2  ;;  %s1014_s0 = sand.u32 1, %s1369_s17  }
 0x81f   : > { %s1015_s23 = scalar_lea.sflag [#allocation5], %s1014_s0 }
 0x820   : > { %p1212_p7 = pnand %p1215_p6, %p1525_p9 }
 0x822   : > { %1364 = dma.done.wait (!%p1212_p7), %s1015_s23, 128  }
 0x823   : > { %1366 = vsyncadd (!%p1212_p7), %s1015_s23, 4294967168  ;;  %s24_s24 = sadd.s32 1, %s1397_s24   ;;  %s1727_s14 = sld [smem:[#allocation11_spill]] }
 0x824   : > { %p21_p8 = scmp.ge.s32.totalorder %s24_s24, 6   ;;  %s1728_s20 = sld [smem:[#allocation7_spill]] }
 0x825   : > { %s1729_s21 = sld [smem:[#allocation8_spill]]  ;;  %s1730_s22 = sld [smem:[#allocation9_spill]] }
 0x826   : > { %s1731_s23 = sld [smem:[#allocation10_spill]]  ;;  %s1732_s17 = smov %s1373_s18 }
 0x827   : > { %s1733_s18 = smov %s1377_s19  ;;  %23 = sbr.rel (!%p21_p8) target bundleno = 7 (0x7), region = 115 }
 0x829   : > { %s1734_s19 = smov %s1727_s14 }
 0x82e   :  { %1020 = vsyncpa [#allocation5], 1 }
 0x82f   :  { %1022 = vsyncpa [#allocation5 + $0x1], 1 }

</bundles_post_ra>
